<compile_context>
chip_gen: v7x
topology: tpu7x:2x2x1
jax: 0.10.0
libtpu: 0.0.40
codegen_flags: <defaults>
</compile_context>

<pallas_src>
import functools

import jax
import jax.numpy as jnp
from jax.experimental import pallas as pl
from jax.experimental.pallas import tpu as pltpu


def _residual_linear_kernel(x_ref, w_ref, b_ref, o_ref):
    # One (tm, D) row tile: bf16 MXU matmul with f32 accumulation,
    # bias + residual on the VPU in f32 (free filler under MXU/HBM slack).
    x = x_ref[...]                                            # (tm, D) f32
    y = jnp.dot(x.astype(jnp.bfloat16), w_ref[...],           # bf16 @ bf16 -> f32
                preferred_element_type=jnp.float32)
    y = y + b_ref[...]                                        # (1, D) broadcast
    o_ref[...] = (x + y).astype(o_ref.dtype)


def _round_up(v, m):
    return ((v + m - 1) // m) * m


def _vmem_capacity_and_budget():
    # Per-TensorCore physical VMEM (v5e/v6e: 128 MiB, v7x: 64 MiB), with ~25%
    # headroom left for compiler-internal scratch.
    try:
        cap = int(pltpu.get_tpu_info().vmem_capacity_bytes)
    except Exception:
        cap = 64 << 20                       # conservative default (v7x per-core)
    return cap, int(cap * 0.75)


@functools.partial(jax.jit, static_argnames=("tm",))
def residual_linear(x2d, w_t, b, *, tm=None):
    """x2d: (M, D) f32; w_t: (D_in, D_out) = W^T (pre-transposed); b: (D,)."""
    M, D = x2d.shape

    w_bf16 = w_t.astype(jnp.bfloat16)        # resident weight, half the footprint
    b_f32 = b.astype(jnp.float32).reshape(1, D)

    cap, budget = _vmem_capacity_and_budget()
    w_bytes = D * D * 2                      # bf16, single-buffered
    b_bytes = D * 4
    stream_bytes_per_row = 16 * D            # x + out tiles, f32, double-buffered

    if tm is None:
        avail = budget - w_bytes - b_bytes
        if avail < 8 * stream_bytes_per_row:
            # TODO(synk): K/N-tiled accumulator path for non-resident weights.
            raise NotImplementedError(
                "hidden too large for the VMEM-resident-weight path")
        tm = max(8, min(avail // stream_bytes_per_row, 1024, _round_up(M, 8)))
        tm = (tm // 8) * 8
        # Megacore balance (only pays on v7x): avoid a single-tile grid when
        # there is enough work to split across the two TensorCores.
        if pl.cdiv(M, tm) == 1 and M >= 16:
            tm = _round_up(pl.cdiv(M, 2), 8)

    # Partial last row tile is handled by Pallas; rows are independent and
    # out-of-bounds output rows are discarded (never tile K/contraction this way).
    grid = (pl.cdiv(M, tm),)

    req = w_bytes + b_bytes + tm * stream_bytes_per_row
    vmem_limit = min(max(req + (4 << 20), 32 << 20), int(cap * 0.9))

    cost = pl.CostEstimate(
        flops=2 * M * D * D + 2 * M * D,
        transcendentals=0,
        bytes_accessed=2 * 4 * M * D + w_bytes + b_bytes,
    )

    return pl.pallas_call(
        _residual_linear_kernel,
        out_shape=jax.ShapeDtypeStruct((M, D), x2d.dtype),
        grid_spec=pltpu.PrefetchScalarGridSpec(
            num_scalar_prefetch=0,
            grid=grid,
            in_specs=[
                # Streamed x row tile (default double-buffering).
                pl.BlockSpec((tm, D), lambda i: (i, 0)),
                # Constant operands: DMA'd once, single buffer (no dead copy).
                pl.BlockSpec((D, D), lambda i: (0, 0),
                             pipeline_mode=pl.Buffered(1)),
                pl.BlockSpec((1, D), lambda i: (0, 0),
                             pipeline_mode=pl.Buffered(1)),
            ],
            out_specs=pl.BlockSpec((tm, D), lambda i: (i, 0)),
        ),
        compiler_params=pltpu.CompilerParams(
            dimension_semantics=("parallel",),   # independent row tiles -> megacore
            vmem_limit_bytes=vmem_limit,
        ),
        cost_estimate=cost,
    )(x2d, w_bf16, b_f32)


if __name__ == "__main__":
    key = jax.random.PRNGKey(0)
    kx, kw, kb = jax.random.split(key, 3)

    batch, seq, hidden = 2, 8, 32
    x = jax.random.normal(kx, (batch, seq, hidden), dtype=jnp.float32)

    # Deterministic params mimicking nn.Linear(hidden, hidden) init:
    # uniform(-1/sqrt(hidden), 1/sqrt(hidden)); PyTorch weight layout is (out, in).
    bound = 1.0 / (hidden ** 0.5)
    w = jax.random.uniform(kw, (hidden, hidden), minval=-bound, maxval=bound,
                           dtype=jnp.float32)
    b = jax.random.uniform(kb, (hidden,), minval=-bound, maxval=bound,
                           dtype=jnp.float32)

    x2d = x.reshape(batch * seq, hidden)
    out = residual_linear(x2d, w.T, b)          # pre-transpose weight to (in, out)
    out = out.reshape(batch, seq, hidden)
    jax.block_until_ready(out)

    # Reference: x + Linear(x) in f32.  Tolerances account for the bf16 MXU
    # operands (f32 accumulation keeps the error small).
    ref = x + (jnp.einsum("bsh,oh->bso", x, w) + b)
    assert jnp.allclose(out, ref, atol=3e-2, rtol=3e-2), "mismatch vs reference"

    print("KERNEL_OK")
</pallas_src>

<mosaic_0001>
module attributes {stable_mosaic.version = 11 : i64} {
  func.func @_residual_linear_kernel(%arg0: i32, %arg1: memref<8x32xf32, #tpu.memory_space<vmem>>, %arg2: memref<32x32xbf16, #tpu.memory_space<vmem>>, %arg3: memref<1x32xf32, #tpu.memory_space<vmem>>, %arg4: memref<8x32xf32, #tpu.memory_space<vmem>>) attributes {dimension_semantics = [#tpu.dimension_semantics<parallel>], iteration_bounds = array<i64: 2>, scalar_prefetch = 0 : i64, scratch_operands = 0 : i64, tpu.core_type = #tpu.core_type<tc>, window_params = [{transform_indices = @transform_0, window_bounds = array<i64: 8, 32>}, {pipeline_mode = #tpu.pipeline_mode<synchronous>, transform_indices = @transform_1, window_bounds = array<i64: 32, 32>}, {pipeline_mode = #tpu.pipeline_mode<synchronous>, transform_indices = @transform_2, window_bounds = array<i64: 1, 32>}, {transform_indices = @transform_3, window_bounds = array<i64: 8, 32>}]} {
    %c0 = arith.constant 0 : index
    %c0_0 = arith.constant 0 : index
    %0 = vector.load %arg1[%c0, %c0_0] : memref<8x32xf32, #tpu.memory_space<vmem>>, vector<8x32xf32>
    %1 = arith.truncf %0 : vector<8x32xf32> to vector<8x32xbf16>
    %c0_1 = arith.constant 0 : index
    %c0_2 = arith.constant 0 : index
    %2 = vector.load %arg2[%c0_1, %c0_2] : memref<32x32xbf16, #tpu.memory_space<vmem>>, vector<32x32xbf16>
    %cst = arith.constant dense<0.000000e+00> : vector<8x32xf32>
    %3 = tpu.matmul %1, %2, %cst {dimension_numbers = #tpu.dot_dimension_numbers<[1], [0], [0], [1], [0, 0, 1, 1], [], []>} : vector<8x32xbf16>, vector<32x32xbf16>, vector<8x32xf32> -> vector<8x32xf32>
    %c0_3 = arith.constant 0 : index
    %c0_4 = arith.constant 0 : index
    %4 = vector.load %arg3[%c0_3, %c0_4] : memref<1x32xf32, #tpu.memory_space<vmem>>, vector<1x32xf32>
    %5 = vector.broadcast %4 : vector<1x32xf32> to vector<8x32xf32>
    %6 = arith.addf %3, %5 : vector<8x32xf32>
    %7 = arith.addf %0, %6 : vector<8x32xf32>
    %c0_5 = arith.constant 0 : index
    %c0_6 = arith.constant 0 : index
    %8 = vector.load %arg4[%c0_5, %c0_6] : memref<8x32xf32, #tpu.memory_space<vmem>>, vector<8x32xf32>
    tpu.vector_store %arg4[%c0_5, %c0_6], %7 {strides = array<i32>} : memref<8x32xf32, #tpu.memory_space<vmem>>, vector<8x32xf32>,
    return
  }
  func.func @transform_0(%arg0: i32) -> (i32, i32) {
    %c0_i32 = arith.constant 0 : i32
    %c0_i32_0 = arith.constant 0 : i32
    return %arg0, %c0_i32 : i32, i32
  }
  func.func @transform_1(%arg0: i32) -> (i32, i32) {
    %c0_i32 = arith.constant 0 : i32
    %c0_i32_0 = arith.constant 0 : i32
    %c0_i32_1 = arith.constant 0 : i32
    return %c0_i32, %c0_i32_0 : i32, i32
  }
  func.func @transform_2(%arg0: i32) -> (i32, i32) {
    %c0_i32 = arith.constant 0 : i32
    %c0_i32_0 = arith.constant 0 : i32
    %c0_i32_1 = arith.constant 0 : i32
    return %c0_i32, %c0_i32_0 : i32, i32
  }
  func.func @transform_3(%arg0: i32) -> (i32, i32) {
    %c0_i32 = arith.constant 0 : i32
    %c0_i32_0 = arith.constant 0 : i32
    return %arg0, %c0_i32 : i32, i32
  }
}

</mosaic_0001>

<bundles_post_ra>
// kernel: residual_linear.1
= control target key start
LH: loop header
LB: loop body
LE: loop exit
PB: predicated region body
PF: predicated region fallthrough
CT: control target
= control target key end

     0   :  { %8 = vsyncpa [#allocation3], 0  ;;  %s577_s0 = inlined_call_operand.vmem [shape: f32[16,32], index: 0, kind: input, shape index: {}]   ;;  %s578_s1 = inlined_call_operand.vmem [shape: bf16[32,32], index: 1, kind: input, shape index: {}]   ;;  %s579_s2 = inlined_call_operand.vmem [shape: f32[1,32], index: 2, kind: input, shape index: {}]   ;;  %s580_s3 = inlined_call_operand.hbm [shape: f32[16,32], index: 3, kind: output, shape index: {}]  }
   0x1   :  { %10 = vsyncpa [#allocation3 + $0x1], 0  ;;  %s466_s12 = smov 0   ;;  %s468_s13 = smov 0  }
   0x2   :  { %s470_s14 = smov 0   ;;  %s472_s15 = smov 0  }
   0x3 LB: > { %s487_s16 = sadd.s32 4294967295, %s441_s15   ;;  %s311_s17 = sadd.s32 4294967294, %s441_s15   ;;  %s441_s15 = sphi %s472_s15, %s586_s15   ;;  %s437_s14 = sphi %s470_s14, %s585_s14   ;;  %s433_s13 = sphi %s468_s13, %s584_s13   ;;  %s429_s12 = sphi %s466_s12, %s583_s12  }
   0x4   : > { %s491_s18 = sadd.s32 1, %s441_s15   ;;  %s91_s19 = sadd.s32 1, %s437_s14 }
   0x5   : > { %s88_s20 = ssub.s32 %s441_s15, %s491_s18  ;;  %p101_p0 = scmp.ne.s32.totalorder %s437_s14, %s433_s13 }
   0x6   : > { %p89_p1 = scmp.eq.s32.totalorder %s88_s20, 0  ;;  %p102_p2 = scmp.eq.s32.totalorder %s487_s16, 1 }
   0x7   : > { %p107_p3 = scmp.ne.s32.totalorder %s433_s13, %s429_s12  ;;  %p108_p4 = scmp.eq.s32.totalorder %s311_s17, 1 }
   0x8   : > { %s502_s21 = scalar_select %p89_p1, %s437_s14, %s91_s19  }
   0x9   : > { %p504_p5 = por %p102_p2, %p101_p0  ;;  %p508_p6 = por %p108_p4, %p107_p3 }
   0xa   : > { %p314_p7 = scmp.ge.s32.totalorder %s441_s15, 1  ;;  %p139_p8 = scmp.lt.s32.totalorder %s441_s15, 3 }
   0xc   : > { %p140_p9 = pnand %p314_p7, %p139_p8 }
   0xd   : > { %v377_v0 = vld [vmem:[%s578_s1] sm:$0xff] (!%p140_p9)   ;;  %v443_v1 = vmov (!%p140_p9), 0.0   ;;  %v378_v2 = vld [vmem:[%s578_s1 + $0x8] sm:$0xff] (!%p140_p9)   ;;  %vm444_vm0 = vmmov (!%p140_p9), 0   ;;  %p162_p10 = scmp.lt.s32.totalorder (!%p140_p9), %s487_s16, 1  ;;  %vm192_vm1 = vcmask (!%p140_p9), 261120  }
   0xe   : > { %143 = sbr.rel (%p140_p9) target bundleno = 258 (0x102), region = 32  ;;  %328 = vmatprep.subr.bf16.mxu0 (!%p140_p9), %v443_v1  ;;  %332 = vmatprep.mubr.msk.bf16.mxu0 (!%p140_p9), %vm444_vm0, %v443_v1  ;;  %s159_s6 = sand.u32 (!%p140_p9), 1, %s433_s13   ;;  %v317_v5 = vld [vmem:[%s579_s2] ss:$0 sm:$0xff] (!%p140_p9) }
   0xf   : > { %329 = vmatpush3.bf16.msra.mxu0 (!%p140_p9), %v377_v0  ;;  %s315_s7 = sshll.u32 (!%p140_p9), %s159_s6, 3  ;;  %s322_s10 = sshll.u32 (!%p140_p9), %s487_s16, 7 }
  0x10   : > { %330 = vmatprep.subr.bf16.mxu0 (!%p140_p9), %v443_v1  ;;  %s161_s11 = scalar_lea.vmem (!%p140_p9), [#allocation2], %s315_s7  ;;  %s534_s24 = scalar_lea.hbm (!%p140_p9), %s580_s3, %s322_s10 }
  0x11   : > { %s252_s17 = sshll.u32 (!%p140_p9), %s161_s11, 4  ;;  %s445_s26 = smov (!%p140_p9), [#allocation2]   ;;  %s536_s17 = int_to_ptr.vmem [resolvable:$true] %s252_s17 }
  0x12   : > { %s379_s25 = scalar_lea.vmem (!%p140_p9), %s536_s17, 128  ;;  %s383_s27 = sshll.u32 (!%p140_p9), %s445_s26, 4  ;;  %s384_s27 = int_to_ptr.vmem [resolvable:$false] %s383_s27 }
  0x13   : > { %331 = vmatpush3.bf16.msra.mxu0 (!%p140_p9), %v378_v2  ;;  %p380_p11 = scmp.ne.s32.totalorder (!%p140_p9), %s536_s17, %s379_s25  ;;  %p386_p0 = scmp.lt.s32.totalorder (!%p140_p9), %s536_s17, %s384_s27 }
  0x15   : > { %s163_s28 = scalar_select %p162_p10, %s487_s16, 1 }
  0x16   : > { %s239_s16 = scalar_lea.sflag [#allocation3], %s159_s6  ;;  %p381_p12 = pnand %p380_p11, %p504_p5 }
  0x17   : > { %s316_s29 = sshll.u32 %s163_s28, 3  ;;  %s385_s28 = scalar_lea.vmem %s384_s27, 256 }
  0x18   : > { %s165_s5 = scalar_lea.vmem %s577_s0, %s316_s29  ;;  %p382_p13 = pneg %p381_p12 }
  0x19   : > { %v167_v3 = vld [vmem:[%s165_s5] sm:$0xff]  ;;  %p387_p1 = scmp.lt.s32.totalorder %s385_s28, %s379_s25 }
  0x1a   : > { %v168_v4 = vpack.c.bf16 %v167_v3, %v167_v3 }
  0x1b   : > { %p388_p2 = por %p387_p1, %p386_p0 }
  0x1c   : > { %333 = vmatmul.mubr.msk.bf16.vlgmr.msra.gmra.mrb[0].mxu0 %vm192_vm1, %v168_v4 }
  0x1d   : > { %p389_p3 = pnand %p388_p2, %p382_p13 }
  0xef   : > { %v230_v6 = vpop.f32.mrb[0].mxu0 }
  0xf0   : > { %v231_v7 = vadd.f32 %v317_v5, %v230_v6  ;;  %v334_v8 = vpop.f32.mrb[1].mxu0 }
  0xf1   : > { %v233_v9 = vpop.f32.mrb[2].mxu0 }
  0xf2   : > { %v236_v10 = vadd.f32 %v231_v7, %v167_v3  ;;  %v335_v11 = vpop.f32.mrb[3].mxu0 }
  0xf4   : > { %237 = vst.msk [vmem:[%s161_s11] sm:$0xff] %vm192_vm1, %v236_v10 }
  0xf5   : > { %392 = shalt.err (!%p389_p3)
}
  0xf6   : > { %s393_s29 = scalar_lea.hbm %s534_s24, 128  ;;  %s397_s5 = scalar_lea.hbm %s580_s3, 256 }
  0xf7   : > { %p394_p4 = scmp.ne.s32.totalorder %s534_s24, %s393_s29  ;;  %p398_p9 = scmp.lt.u32.totalorder %s534_s24, %s580_s3 }
  0xf8   : > { %p399_p10 = scmp.lt.u32.totalorder %s397_s5, %s393_s29  ;;  %p401_p12 = scmp.lt.u32.totalorder %s393_s29, %s534_s24 }
  0xf9   : > { %p395_p7 = pnand %p394_p4, %p504_p5 }
  0xfa   : > { %p400_p11 = por %p399_p10, %p398_p9 }
  0xfb   : > { %p396_p8 = pneg %p395_p7 }
  0xfc   : > { %p402_p13 = por %p401_p12, %p400_p11 }
  0xfe   : > { %p403_p0 = pnand %p402_p13, %p396_p8 }
 0x100   : > { %406 = shalt.err (!%p403_p0)
}
 0x101   : > { %336 = dma.vmem_to_hbm [thread:$0]  (%p504_p5), %s536_s17, 128, %s534_s24, %s239_s16  }
 0x102 PF: > { %p342_p1 = scmp.ge.s32.totalorder %s441_s15, 2  ;;  %s264_s8 = sand.u32 1, %s429_s12  }
 0x103   : > { %s265_s9 = scalar_lea.sflag [#allocation3], %s264_s8 }
 0x104   : > { %p339_p2 = pnand %p342_p1, %p508_p6 }
 0x106   : > { %424 = dma.done.wait (!%p339_p2), %s265_s9, 128  }
 0x107   : > { %426 = vsyncadd (!%p339_p2), %s265_s9, 4294967168  ;;  %p13_p3 = scmp.ge.s32.totalorder %s491_s18, 4   ;;  %s583_s12 = smov %s433_s13 }
 0x108   : > { %s584_s13 = smov %s437_s14  ;;  %s585_s14 = smov %s502_s21 }
 0x109   : > { %s586_s15 = smov %s491_s18  ;;  %15 = sbr.rel (!%p13_p3) target bundleno = 3 (0x3), region = 67 }
 0x110   :  { %270 = vsyncpa [#allocation3], 1 }
 0x111   :  { %272 = vsyncpa [#allocation3 + $0x1], 1 }

</bundles_post_ra>
